<compile_context>
chip_gen: v5e
topology: v5e:2x2
jax: 0.10.0
libtpu: 0.0.40
codegen_flags: <defaults>
</compile_context>

<pallas_src>
import jax
import jax.numpy as jnp
from jax.experimental import pallas as pl
from jax.experimental.pallas import tpu as pltpu


def _round_up(x, m):
    return (x + m - 1) // m * m


def _multidec_kernel(x_ref, we_ref, be_ref, wd_ref, bd_ref, o_ref, acc_ref):
    # x_ref : [tm, tk]       bf16 flattened-image tile
    # we_ref: [tk, INF]      bf16 encoder weight K-slab (streamed over k)
    # be_ref: [1, INF]       f32 encoder bias          (resident)
    # wd_ref: [INF, NC_pad]  bf16 stacked decoder cols (resident)
    # bd_ref: [1, NC_pad]    f32 stacked decoder biases(resident)
    # o_ref : [tm, NC_pad]   f32 output tile (lane-dense, written at finalize)
    # acc_ref: [tm, INF]     f32 encoder-feature accumulator (VMEM scratch)
    k = pl.program_id(1)

    @pl.when(k == 0)
    def _init():
        acc_ref[...] = jnp.zeros_like(acc_ref)

    # encoder partial matmul: MXU, bf16 inputs, f32 accumulation
    acc_ref[...] += jnp.dot(
        x_ref[...], we_ref[...], preferred_element_type=jnp.float32
    )

    @pl.when(k == pl.num_programs(1) - 1)
    def _finalize():
        # bias + ReLU on the full f32 accumulator, then the fused decoder
        # matmul (== torch.cat of nc LinearDecoder(inf, 1) heads along dim=1).
        feats = jnp.maximum(acc_ref[...] + be_ref[...], 0.0)
        out = jnp.dot(
            feats.astype(wd_ref.dtype), wd_ref[...],
            preferred_element_type=jnp.float32,
        ) + bd_ref[...]
        o_ref[...] = out.astype(o_ref.dtype)


def multidec_forward(x_nchw, w_enc, b_enc, w_dec, b_dec):
    B = x_nchw.shape[0]
    D, INF = w_enc.shape
    NC = w_dec.shape[1]

    # glue: flatten NCHW -> [B, C*H*W] (matches torch.flatten(x, 1))
    x_flat = x_nchw.reshape(B, -1)

    # Tile sizes: MXU-filling batch tile for large B, minimal padding for tiny B;
    # large streamed K tile (>=512) for HBM-roofline efficiency.
    tm = 256 if B >= 256 else _round_up(B, 8)
    tk = 512 if D >= 512 else _round_up(D, 128)
    B_pad = _round_up(B, tm)
    D_pad = _round_up(D, tk)
    NC_pad = _round_up(NC, 128)  # lane-dense output store

    # bf16 activations/weights (f32 accumulation in-kernel); zero padding is
    # mathematically inert (zero rows/cols contribute nothing, sliced off below).
    xb = jnp.pad(x_flat.astype(jnp.bfloat16), ((0, B_pad - B), (0, D_pad - D)))
    web = jnp.pad(w_enc.astype(jnp.bfloat16), ((0, D_pad - D), (0, 0)))
    be = b_enc.reshape(1, INF).astype(jnp.float32)
    wdb = jnp.pad(w_dec.astype(jnp.bfloat16), ((0, 0), (0, NC_pad - NC)))
    bd = jnp.pad(b_dec.reshape(1, NC).astype(jnp.float32),
                 ((0, 0), (0, NC_pad - NC)))

    grid = (B_pad // tm, D_pad // tk)

    in_specs = [
        pl.BlockSpec((tm, tk), lambda i, k: (i, k)),        # x        (streamed)
        pl.BlockSpec((tk, INF), lambda i, k: (k, 0)),       # w_enc    (streamed)
        pl.BlockSpec((1, INF), lambda i, k: (0, 0)),        # b_enc    (resident)
        pl.BlockSpec((INF, NC_pad), lambda i, k: (0, 0)),   # w_dec    (resident)
        pl.BlockSpec((1, NC_pad), lambda i, k: (0, 0)),     # b_dec    (resident)
    ]
    out_specs = pl.BlockSpec((tm, NC_pad), lambda i, k: (i, 0))

    flops = 2 * B_pad * D_pad * INF + 2 * B_pad * INF * NC_pad
    bytes_accessed = (
        (B_pad * D_pad + D_pad * INF + INF * NC_pad) * 2     # bf16 operands
        + B_pad * NC_pad * 4                                 # f32 output
        + (INF + NC_pad) * 4                                 # f32 biases
    )

    out_pad = pl.pallas_call(
        _multidec_kernel,
        out_shape=jax.ShapeDtypeStruct((B_pad, NC_pad), jnp.float32),
        grid_spec=pltpu.PrefetchScalarGridSpec(
            num_scalar_prefetch=0,
            grid=grid,
            in_specs=in_specs,
            out_specs=out_specs,
            scratch_shapes=[pltpu.VMEM((tm, INF), jnp.float32)],
        ),
        compiler_params=pltpu.CompilerParams(
            dimension_semantics=("parallel", "arbitrary"),
            vmem_limit_bytes=32 * 1024 * 1024,
        ),
        cost_estimate=pl.CostEstimate(
            flops=flops, transcendentals=0, bytes_accessed=bytes_accessed
        ),
    )(xb, web, be, wdb, bd)

    return out_pad[:B, :NC]


def _reference(x_nchw, w_enc, b_enc, w_dec, b_dec):
    # Mirrors the kernel's numerics (bf16 operands, f32 accumulation).
    x = x_nchw.reshape(x_nchw.shape[0], -1).astype(jnp.bfloat16)
    feats = jnp.dot(x, w_enc.astype(jnp.bfloat16),
                    preferred_element_type=jnp.float32) + b_enc
    feats = jnp.maximum(feats, 0.0)
    return jnp.dot(feats.astype(jnp.bfloat16), w_dec.astype(jnp.bfloat16),
                   preferred_element_type=jnp.float32) + b_dec


if __name__ == "__main__":
    # Small shapes consistent with the module's forward:
    #   image batch [B, C, H, W], encoder out_features INF, NC classes.
    B, C, H, W = 2, 4, 16, 16
    D = C * H * W        # 1024
    INF = 32             # encoder.out_features()
    NC = 4               # number of decoders / classes

    key = jax.random.PRNGKey(0)
    k_x, k_we, k_be, k_wd, k_bd = jax.random.split(key, 5)

    x = jax.random.normal(k_x, (B, C, H, W), dtype=jnp.float32)

    # Deterministic synthetic parameters (scaled like nn.Linear init magnitudes).
    w_enc = jax.random.normal(k_we, (D, INF), dtype=jnp.float32) * (1.0 / jnp.sqrt(D))
    b_enc = jax.random.normal(k_be, (1, INF), dtype=jnp.float32) * 0.01
    # nc independent LinearDecoder(INF, 1) weights stacked column-wise.
    w_dec = jax.random.normal(k_wd, (INF, NC), dtype=jnp.float32) * (1.0 / jnp.sqrt(INF))
    b_dec = jax.random.normal(k_bd, (1, NC), dtype=jnp.float32) * 0.01

    fwd = jax.jit(multidec_forward)
    out = fwd(x, w_enc, b_enc, w_dec, b_dec)
    out = jax.block_until_ready(out)

    ref = _reference(x, w_enc, b_enc, w_dec, b_dec)
    assert out.shape == (B, NC), out.shape
    assert jnp.allclose(out, ref, atol=1e-3, rtol=1e-3), "mismatch vs reference"

    print("KERNEL_OK")
</pallas_src>

<mosaic_0001>
module attributes {stable_mosaic.version = 11 : i64} {
  func.func @_multidec_kernel(%arg0: i32, %arg1: i32, %arg2: memref<8x512xbf16, #tpu.memory_space<vmem>>, %arg3: memref<512x32xbf16, #tpu.memory_space<vmem>>, %arg4: memref<1x32xf32, #tpu.memory_space<vmem>>, %arg5: memref<32x128xbf16, #tpu.memory_space<vmem>>, %arg6: memref<1x128xf32, #tpu.memory_space<vmem>>, %arg7: memref<8x128xf32, #tpu.memory_space<vmem>>, %arg8: memref<8x32xf32, #tpu.memory_space<vmem>>) attributes {dimension_semantics = [#tpu.dimension_semantics<parallel>, #tpu.dimension_semantics<arbitrary>], iteration_bounds = array<i64: 1, 2>, scalar_prefetch = 0 : i64, scratch_operands = 1 : i64, tpu.core_type = #tpu.core_type<tc>, window_params = [{transform_indices = @transform_0, window_bounds = array<i64: 8, 512>}, {transform_indices = @transform_1, window_bounds = array<i64: 512, 32>}, {pipeline_mode = #tpu.pipeline_mode<synchronous>, transform_indices = @transform_2, window_bounds = array<i64: 1, 32>}, {pipeline_mode = #tpu.pipeline_mode<synchronous>, transform_indices = @transform_3, window_bounds = array<i64: 32, 128>}, {pipeline_mode = #tpu.pipeline_mode<synchronous>, transform_indices = @transform_4, window_bounds = array<i64: 1, 128>}, {transform_indices = @transform_5, window_bounds = array<i64: 8, 128>}]} {
    %c0_i32 = arith.constant 0 : i32
    %0 = arith.cmpi eq, %arg1, %c0_i32 : i32
    %1 = arith.extui %0 : i1 to i32
    %c0_i32_0 = arith.constant 0 : i32
    %2 = arith.cmpi ne, %1, %c0_i32_0 : i32
    scf.if %2 {
      %cst_9 = arith.constant 0.000000e+00 : f32
      %12 = vector.broadcast %cst_9 : f32 to vector<8x32xf32>
      %c0_10 = arith.constant 0 : index
      %c0_11 = arith.constant 0 : index
      %13 = vector.load %arg8[%c0_10, %c0_11] : memref<8x32xf32, #tpu.memory_space<vmem>>, vector<8x32xf32>
      tpu.vector_store %arg8[%c0_10, %c0_11], %12 {strides = array<i32>} : memref<8x32xf32, #tpu.memory_space<vmem>>, vector<8x32xf32>,
    } else {
    }
    %c0 = arith.constant 0 : index
    %c0_1 = arith.constant 0 : index
    %3 = vector.load %arg8[%c0, %c0_1] : memref<8x32xf32, #tpu.memory_space<vmem>>, vector<8x32xf32>
    %c0_2 = arith.constant 0 : index
    %c0_3 = arith.constant 0 : index
    %4 = vector.load %arg2[%c0_2, %c0_3] : memref<8x512xbf16, #tpu.memory_space<vmem>>, vector<8x512xbf16>
    %c0_4 = arith.constant 0 : index
    %c0_5 = arith.constant 0 : index
    %5 = vector.load %arg3[%c0_4, %c0_5] : memref<512x32xbf16, #tpu.memory_space<vmem>>, vector<512x32xbf16>
    %cst = arith.constant dense<0.000000e+00> : vector<8x32xf32>
    %6 = tpu.matmul %4, %5, %cst {dimension_numbers = #tpu.dot_dimension_numbers<[1], [0], [0], [1], [0, 0, 1, 1], [], []>} : vector<8x512xbf16>, vector<512x32xbf16>, vector<8x32xf32> -> vector<8x32xf32>
    %7 = arith.addf %3, %6 : vector<8x32xf32>
    %c0_6 = arith.constant 0 : index
    %c0_7 = arith.constant 0 : index
    %8 = vector.load %arg8[%c0_6, %c0_7] : memref<8x32xf32, #tpu.memory_space<vmem>>, vector<8x32xf32>
    tpu.vector_store %arg8[%c0_6, %c0_7], %7 {strides = array<i32>} : memref<8x32xf32, #tpu.memory_space<vmem>>, vector<8x32xf32>,
    %c1_i32 = arith.constant 1 : i32
    %9 = arith.cmpi eq, %arg1, %c1_i32 : i32
    %10 = arith.extui %9 : i1 to i32
    %c0_i32_8 = arith.constant 0 : i32
    %11 = arith.cmpi ne, %10, %c0_i32_8 : i32
    scf.if %11 {
      %c0_9 = arith.constant 0 : index
      %c0_10 = arith.constant 0 : index
      %12 = vector.load %arg8[%c0_9, %c0_10] : memref<8x32xf32, #tpu.memory_space<vmem>>, vector<8x32xf32>
      %c0_11 = arith.constant 0 : index
      %c0_12 = arith.constant 0 : index
      %13 = vector.load %arg4[%c0_11, %c0_12] : memref<1x32xf32, #tpu.memory_space<vmem>>, vector<1x32xf32>
      %14 = vector.broadcast %13 : vector<1x32xf32> to vector<8x32xf32>
      %15 = arith.addf %12, %14 : vector<8x32xf32>
      %cst_13 = arith.constant 0.000000e+00 : f32
      %16 = vector.broadcast %cst_13 : f32 to vector<8x32xf32>
      %17 = arith.maximumf %15, %16 : vector<8x32xf32>
      %18 = arith.truncf %17 : vector<8x32xf32> to vector<8x32xbf16>
      %c0_14 = arith.constant 0 : index
      %c0_15 = arith.constant 0 : index
      %19 = vector.load %arg5[%c0_14, %c0_15] : memref<32x128xbf16, #tpu.memory_space<vmem>>, vector<32x128xbf16>
      %cst_16 = arith.constant dense<0.000000e+00> : vector<8x128xf32>
      %20 = tpu.matmul %18, %19, %cst_16 {dimension_numbers = #tpu.dot_dimension_numbers<[1], [0], [0], [1], [0, 0, 1, 1], [], []>} : vector<8x32xbf16>, vector<32x128xbf16>, vector<8x128xf32> -> vector<8x128xf32>
      %c0_17 = arith.constant 0 : index
      %c0_18 = arith.constant 0 : index
      %21 = vector.load %arg6[%c0_17, %c0_18] : memref<1x128xf32, #tpu.memory_space<vmem>>, vector<1x128xf32>
      %22 = vector.broadcast %21 : vector<1x128xf32> to vector<8x128xf32>
      %23 = arith.addf %20, %22 : vector<8x128xf32>
      %c0_19 = arith.constant 0 : index
      %c0_20 = arith.constant 0 : index
      %24 = vector.load %arg7[%c0_19, %c0_20] : memref<8x128xf32, #tpu.memory_space<vmem>>, vector<8x128xf32>
      tpu.vector_store %arg7[%c0_19, %c0_20], %23 {strides = array<i32>} : memref<8x128xf32, #tpu.memory_space<vmem>>, vector<8x128xf32>,
    } else {
    }
    return
  }
  func.func @transform_0(%arg0: i32, %arg1: i32) -> (i32, i32) {
    %c0_i32 = arith.constant 0 : i32
    return %arg0, %arg1 : i32, i32
  }
  func.func @transform_1(%arg0: i32, %arg1: i32) -> (i32, i32) {
    %c0_i32 = arith.constant 0 : i32
    %c0_i32_0 = arith.constant 0 : i32
    return %arg1, %c0_i32 : i32, i32
  }
  func.func @transform_2(%arg0: i32, %arg1: i32) -> (i32, i32) {
    %c0_i32 = arith.constant 0 : i32
    %c0_i32_0 = arith.constant 0 : i32
    %c0_i32_1 = arith.constant 0 : i32
    return %c0_i32, %c0_i32_0 : i32, i32
  }
  func.func @transform_3(%arg0: i32, %arg1: i32) -> (i32, i32) {
    %c0_i32 = arith.constant 0 : i32
    %c0_i32_0 = arith.constant 0 : i32
    %c0_i32_1 = arith.constant 0 : i32
    return %c0_i32, %c0_i32_0 : i32, i32
  }
  func.func @transform_4(%arg0: i32, %arg1: i32) -> (i32, i32) {
    %c0_i32 = arith.constant 0 : i32
    %c0_i32_0 = arith.constant 0 : i32
    %c0_i32_1 = arith.constant 0 : i32
    return %c0_i32, %c0_i32_0 : i32, i32
  }
  func.func @transform_5(%arg0: i32, %arg1: i32) -> (i32, i32) {
    %c0_i32 = arith.constant 0 : i32
    %c0_i32_0 = arith.constant 0 : i32
    return %arg0, %c0_i32 : i32, i32
  }
}

</mosaic_0001>

<bundles_post_ra>
// kernel: multidec_forward.1
= control target key start
LH: loop header
LB: loop body
LE: loop exit
PB: predicated region body
PF: predicated region fallthrough
CT: control target
= control target key end

     0   :  { %s1000_s18 = smov 0   ;;  %s1002_s19 = smov 0   ;;  %s1094_s0 = inlined_call_operand.vmem [shape: bf16[8,1024], index: 0, kind: input, shape index: {}]   ;;  %s1095_s1 = inlined_call_operand.vmem [shape: bf16[1024,32], index: 1, kind: input, shape index: {}]   ;;  %s1096_s2 = inlined_call_operand.vmem [shape: f32[1,32], index: 2, kind: input, shape index: {}]   ;;  %s1097_s3 = inlined_call_operand.vmem [shape: bf16[32,128], index: 3, kind: input, shape index: {}]   ;;  %s1098_s4 = inlined_call_operand.vmem [shape: f32[1,128], index: 4, kind: input, shape index: {}]   ;;  %s1099_s5 = inlined_call_operand.vmem [shape: f32[8,128], index: 5, kind: output, shape index: {}]  }
   0x1   :  { %s1004_s20 = smov 0  }
   0x2 LB: > { %s24_s21 = sadd.s32 1, %s963_s19  ;;  %p737_p0 = scmp.ge.s32.totalorder %s967_s20, 1  ;;  %s967_s20 = sphi %s1004_s20, %s15_s20   ;;  %s963_s19 = sphi %s1002_s19, %s1101_s19   ;;  %s959_s18 = sphi %s1000_s18, %s1100_s18  }
   0x3   : > { %p25_p1 = scmp.ge.s32.totalorder %s24_s21, 2  ;;  %p217_p2 = scmp.lt.s32.totalorder %s967_s20, 3 }
   0x5   : > { %s1103_s21 = smov (%p25_p1, %s24_s21), 0  ;;  %p218_p3 = pnand %p737_p0, %p217_p2 }
   0x6   : > { %s738_s22 = sshll.u32 (!%p218_p3), %s959_s18, 2  ;;  %s740_s23 = sshll.u32 (!%p218_p3), %s959_s18, 6 }
   0x7   : > { %221 = sbr.rel (%p218_p3) target bundleno = 342 (0x156), region = 40  ;;  %p256_p4 = scmp.lt.s32.totalorder (!%p218_p3), %s738_s22, 7 }
   0x8   : > { %p264_p5 = scmp.lt.s32.totalorder (!%p218_p3), %s740_s23, 127  ;;  %p742_p6 = scmp.ne.s32.totalorder (!%p218_p3), %s959_s18, 0 }
   0xc   : > { %s1105_s22 = smov (!%p256_p4, %s738_s22), 7  ;;  %s1107_s23 = smov (!%p264_p5, %s740_s23), 127 }
   0xd   : > { %s739_s24 = sshll.u32 %s1105_s22, 2  ;;  %s741_s28 = sshll.u32 %s1107_s23, 2 }
   0xe   : > { %s1025_s27 = scalar_lea.vmem %s1094_s0, %s739_s24  ;;  %s1030_s6 = scalar_lea.vmem %s1095_s1, %s741_s28 }
   0xf   : > { %277 = sbr.rel (%p742_p6) target bundleno = 22 (0x16), region = 44 }
  0x14   : > { %vm278_vm0 = vcmask 261120   ;;  %v969_v0 = vmov 0.0  }
  0x15   : > { %279 = vst.msk [vmem:[#allocation2] sm:$0xff] %vm278_vm0, %v969_v0 }
  0x16 PF: > { %v891_v1 = vld [vmem:[%s1030_s6 + $0x38] sm:$0xff]  ;;  %v890_v5 = vld [vmem:[%s1030_s6 + $0x30] sm:$0xff]  ;;  %v889_v9 = vld [vmem:[%s1030_s6 + $0x28] sm:$0xff]  ;;  %vm606_vm1 = vcmask 261120   ;;  %p871_p7 = scmp.ne.s32.totalorder %s959_s18, 1 }
  0x17   : > { %v899_v2 = vld [vmem:[%s1030_s6 + $0x78] sm:$0xff]  ;;  %553 = vmatpush.bf16.msra.mxu0 %v891_v1  ;;  %v898_v6 = vld [vmem:[%s1030_s6 + $0x70] sm:$0xff]  ;;  %v897_v10 = vld [vmem:[%s1030_s6 + $0x68] sm:$0xff] }
  0x18   : > { %v907_v3 = vld [vmem:[%s1030_s6 + $0xb8] sm:$0xff]  ;;  %566 = vmatpush.bf16.msra.mxu1 %v899_v2  ;;  %v906_v7 = vld [vmem:[%s1030_s6 + $0xb0] sm:$0xff]  ;;  %v905_v11 = vld [vmem:[%s1030_s6 + $0xa8] sm:$0xff] }
  0x19   : > { %v915_v4 = vld [vmem:[%s1030_s6 + $0xf8] sm:$0xff]  ;;  %579 = vmatpush.bf16.msra.mxu2 %v907_v3  ;;  %v914_v8 = vld [vmem:[%s1030_s6 + $0xf0] sm:$0xff]  ;;  %v913_v12 = vld [vmem:[%s1030_s6 + $0xe8] sm:$0xff] }
  0x1a   : > { %592 = vmatpush.bf16.msra.mxu3 %v915_v4  ;;  %v888_v13 = vld [vmem:[%s1030_s6 + $0x20] sm:$0xff]  ;;  %v887_v17 = vld [vmem:[%s1030_s6 + $0x18] sm:$0xff]  ;;  %v886_v21 = vld [vmem:[%s1030_s6 + $0x10] sm:$0xff] }
  0x1b   : > { %554 = vmatpush.bf16.msra.mxu0 %v890_v5  ;;  %v896_v14 = vld [vmem:[%s1030_s6 + $0x60] sm:$0xff]  ;;  %v895_v18 = vld [vmem:[%s1030_s6 + $0x58] sm:$0xff]  ;;  %v894_v22 = vld [vmem:[%s1030_s6 + $0x50] sm:$0xff] }
  0x1c   : > { %567 = vmatpush.bf16.msra.mxu1 %v898_v6  ;;  %v904_v15 = vld [vmem:[%s1030_s6 + $0xa0] sm:$0xff]  ;;  %v903_v19 = vld [vmem:[%s1030_s6 + $0x98] sm:$0xff]  ;;  %v902_v23 = vld [vmem:[%s1030_s6 + $0x90] sm:$0xff] }
  0x1d   : > { %580 = vmatpush.bf16.msra.mxu2 %v906_v7  ;;  %v912_v16 = vld [vmem:[%s1030_s6 + $0xe0] sm:$0xff]  ;;  %v911_v20 = vld [vmem:[%s1030_s6 + $0xd8] sm:$0xff]  ;;  %v910_v24 = vld [vmem:[%s1030_s6 + $0xd0] sm:$0xff] }
  0x1e   : > { %593 = vmatpush.bf16.msra.mxu3 %v914_v8  ;;  %v885_v25 = vld [vmem:[%s1030_s6 + $0x8] sm:$0xff]  ;;  %v281_v27 = vld [vmem:[%s1025_s27] sm:$0xff] }
  0x1f   : > { %555 = vmatpush.bf16.msra.mxu0 %v889_v9  ;;  %v893_v26 = vld [vmem:[%s1030_s6 + $0x48] sm:$0xff]  ;;  %v349_v31 = vunpack.c.l.b16 %v281_v27  ;;  %v350_v32 = vunpack.c.h.b16 %v281_v27  ;;  %v884_v33 = vld [vmem:[%s1030_s6] sm:$0xff] }
  0x20   : > { %568 = vmatpush.bf16.msra.mxu1 %v897_v10  ;;  %v901_v28 = vld [vmem:[%s1030_s6 + $0x88] sm:$0xff]  ;;  %v892_v34 = vld [vmem:[%s1030_s6 + $0x40] sm:$0xff] }
  0x21   : > { %581 = vmatpush.bf16.msra.mxu2 %v905_v11  ;;  %v909_v29 = vld [vmem:[%s1030_s6 + $0xc8] sm:$0xff]  ;;  %v900_v37 = vld [vmem:[%s1030_s6 + $0x80] sm:$0xff]  ;;  %v353_v39 = vpack.c.b16 %v349_v31, %v349_v31  ;;  %v354_v40 = vpack.c.b16 %v350_v32, %v350_v32 }
  0x22   : > { %594 = vmatpush.bf16.msra.mxu3 %v913_v12  ;;  %v282_v30 = vld [vmem:[%s1025_s27 + $0x8] sm:$0xff]  ;;  %v908_v38 = vld [vmem:[%s1030_s6 + $0xc0] sm:$0xff] }
  0x23   : > { %556 = vmatpush.bf16.msra.mxu0 %v888_v13  ;;  %v351_v35 = vunpack.c.l.b16 %v282_v30  ;;  %v352_v36 = vunpack.c.h.b16 %v282_v30  ;;  %v280_v51 = vld [vmem:[#allocation2] sm:$0xff] }
  0x24   : > { %569 = vmatpush.bf16.msra.mxu1 %v896_v14 }
  0x25   : > { %582 = vmatpush.bf16.msra.mxu2 %v904_v15  ;;  %v355_v41 = vpack.c.b16 %v351_v35, %v351_v35  ;;  %v356_v42 = vpack.c.b16 %v352_v36, %v352_v36 }
  0x26   : > { %595 = vmatpush.bf16.msra.mxu3 %v912_v16 }
  0x27   : > { %557 = vmatpush.bf16.msra.mxu0 %v887_v17 }
  0x28   : > { %570 = vmatpush.bf16.msra.mxu1 %v895_v18 }
  0x29   : > { %583 = vmatpush.bf16.msra.mxu2 %v903_v19 }
  0x2a   : > { %596 = vmatpush.bf16.msra.mxu3 %v911_v20 }
  0x2b   : > { %558 = vmatpush.bf16.msra.mxu0 %v886_v21 }
  0x2c   : > { %571 = vmatpush.bf16.msra.mxu1 %v894_v22 }
  0x2d   : > { %584 = vmatpush.bf16.msra.mxu2 %v902_v23 }
  0x2e   : > { %597 = vmatpush.bf16.msra.mxu3 %v910_v24 }
  0x2f   : > { %559 = vmatpush.bf16.msra.mxu0 %v885_v25 }
  0x30   : > { %572 = vmatpush.bf16.msra.mxu1 %v893_v26 }
  0x31   : > { %585 = vmatpush.bf16.msra.mxu2 %v901_v28 }
  0x32   : > { %598 = vmatpush.bf16.msra.mxu3 %v909_v29 }
  0x33   : > { %560 = vmatpush.bf16.msra.mxu0 %v884_v33 }
  0x34   : > { %573 = vmatpush.bf16.msra.mxu1 %v892_v34 }
  0x35   : > { %586 = vmatpush.bf16.msra.mxu2 %v900_v37 }
  0x36   : > { %599 = vmatpush.bf16.msra.mxu3 %v908_v38  ;;  %561 = vmatmul.bf16.vlgmr.msra.gmra.mxu0 %v353_v39 }
  0x37   : > { %574 = vmatmul.bf16.vlgmr.msra.gmra.mxu1 %v354_v40 }
  0x38   : > { %587 = vmatmul.bf16.vlgmr.msra.gmra.mxu2 %v355_v41 }
  0x39   : > { %600 = vmatmul.bf16.vlgmr.msra.gmra.mxu3 %v356_v42 }
  0xb3   : > { %v562_v43 = vpop.f32.mrf.mxu0 }
  0xb4   : > { %v575_v44 = vpop.f32.mrf.mxu1 }
  0xb5   : > { %v576_v45 = vadd.f32 %v575_v44, %v562_v43 }
  0xbb   : > { %v588_v46 = vpop.f32.mrf.mxu2  ;;  %v564_v49 = vpop.f32.mrf.mxu0 }
  0xbc   : > { %v601_v47 = vpop.f32.mrf.mxu3  ;;  %v589_v48 = vadd.f32 %v588_v46, %v576_v45  ;;  %v577_v50 = vpop.f32.mrf.mxu1 }
  0xbe   : > { %v602_v52 = vadd.f32 %v601_v47, %v589_v48 }
  0xc0   : > { %v605_v53 = vadd.f32 %v602_v52, %v280_v51  ;;  %611 = sbr.rel (%p871_p7) target bundleno = 342 (0x156), region = 48 }
  0xc2   : > { %607 = vst.msk [vmem:[#allocation2] sm:$0xff] %vm606_vm1, %v605_v53 }
  0xc3   : > { %v590_v54 = vpop.f32.mrf.mxu2 }
  0xc4   : > { %v603_v55 = vpop.f32.mrf.mxu3 }
  0xc5   : > { %v917_v56 = vld [vmem:[%s1097_s3 + $0x8] sm:$0xff]  ;;  %v943_v58 = vld [vmem:[%s1096_s2] ss:$0 sm:$0xff] }
  0xc6   : > { %649 = vmatpush.bf16.msra.mxu0 %v917_v56  ;;  %v916_v59 = vld [vmem:[%s1097_s3] sm:$0xff] }
  0xc7   : > { %v944_v63 = vld [vmem:[%s1098_s4] ss:$0 sm:$0xff] }
  0xc9   : > { %v612_v57 = vld [vmem:[#allocation2] sm:$0xff] }
  0xca   : > { %v617_v60 = vadd.f32 %v943_v58, %v612_v57  ;;  %650 = vmatpush.bf16.msra.mxu0 %v916_v59 }
  0xcc   : > { %v618_v61 = vmax.f32 %v617_v60, 0.0 }
  0xce   : > { %v619_v62 = vpack.c.bf16 %v618_v61, %v618_v61 }
  0xd0   : > { %880 = vmatmul.msk.bf16.vlgmr.msra.gmra.mxu0 %vm606_vm1, %v619_v62 }
 0x14d   : > { %v652_v0 = vpop.f32.mrf.mxu0 }
 0x14e   : > { %v653_v1 = vadd.f32 %v944_v63, %v652_v0 }
 0x150   : > { %656 = vst [vmem:[%s1099_s5] sm:$0xff] %v653_v1 }
 0x155   : > { %v654_v2 = vpop.f32.mrf.mxu0 }
 0x156 PF: > { %s15_s20 = sadd.s32 1, %s967_s20   ;;  %s1100_s18 = smov %s963_s19 }
 0x157   : > { %p12_p8 = scmp.ge.s32.totalorder %s15_s20, 4   ;;  %s1101_s19 = smov %s1103_s21 }
 0x159   :  { %14 = sbr.rel (!%p12_p8) target bundleno = 2 (0x2), region = 81 }

</bundles_post_ra>
